<compile_context>
chip_gen: v7x
topology: tpu7x:2x2x1
jax: 0.10.0
libtpu: 0.0.40
codegen_flags: <defaults>
</compile_context>

<pallas_src>
import functools

import jax
import jax.numpy as jnp
from jax import lax
from jax.experimental import pallas as pl
from jax.experimental.pallas import tpu as pltpu


def _conv_stats_kernel(p_ref, w_ref, sum_ref, sq_ref, *, l_out):
    """Pass 1: per-(n, channel) sum / sum-of-squares of the raw conv output.

    The conv bias only shifts the mean (variance is bias-independent) and cancels in train-mode
    BatchNorm, so it is never added here.
    """
    j = pl.program_id(1)

    @pl.when(j == 0)
    def _init():
        sum_ref[...] = jnp.zeros_like(sum_ref)
        sq_ref[...] = jnp.zeros_like(sq_ref)

    # Conv1d tile as a single MXU matmul: (C_out, K) @ (K, TL) -> (C_out, TL), f32 accumulation.
    y = jnp.dot(w_ref[...], p_ref[0], preferred_element_type=jnp.float32)
    tl = y.shape[-1]

    def accumulate(yv):
        sum_ref[0] += jnp.sum(yv, axis=1, keepdims=True)
        sq_ref[0] += jnp.sum(yv * yv, axis=1, keepdims=True)

    if l_out % tl == 0:
        # All tiles are full: no masking anywhere.
        accumulate(y)
    else:
        last = pl.num_programs(1) - 1

        @pl.when(j != last)
        def _full_tile():
            accumulate(y)

        @pl.when(j == last)
        def _partial_tile():
            # Zero the padded lanes of the last (partial) tile so they never pollute the stats.
            lane = lax.broadcasted_iota(jnp.int32, (1, tl), 1)
            accumulate(jnp.where(j * tl + lane < l_out, y, 0.0))


def _norm_act_kernel(p_ref, w_ref, scale_ref, shift_ref, alpha_ref, o_ref):
    """Pass 2: recompute conv tile, fused BatchNorm affine (scale/shift) + PReLU, lane-dense store."""
    y = jnp.dot(w_ref[...], p_ref[0], preferred_element_type=jnp.float32)   # (C_out, TL)
    z = y * scale_ref[...] + shift_ref[...]                                  # per-channel columns
    alpha = alpha_ref[0, 0]                                                  # SMEM scalar
    o_ref[0] = jnp.where(z > 0, z, alpha * z).astype(o_ref.dtype)


def sampcnn_strided_forward(x, weight, bias, gamma, beta, alpha, *, stride,
                            eps=1e-5, compute_dtype=jnp.bfloat16, tile_l=32768,
                            out_dtype=None):
    """x: (N, C_in, L).  weight: (C_out, C_in, ks).  Returns (N, C_out, L_out)."""
    N, C_in, L = x.shape
    C_out, _, ks = weight.shape
    L_out = (L - ks) // stride + 1
    K = C_in * ks
    out_dtype = x.dtype if out_dtype is None else out_dtype
    assert tile_l % 128 == 0, "tile_l must be lane-aligned (multiple of 128)"

    # Wrapper im2col (one HBM pass).  For stride >= ks the windows are non-overlapping, so the
    # patch tensor is a cheap slice + contiguous reshape + small transpose (no XLA gather).
    # TODO(synk): build the (K, TL) view in-kernel from a contiguous x block once Mosaic supports
    # lane-strided ref loads; that would remove this HBM round-trip entirely.
    if stride >= ks and L >= L_out * stride:
        x4 = x[:, :, :L_out * stride].reshape(N, C_in, L_out, stride)
        patches = x4[:, :, :, :ks].transpose(0, 1, 3, 2).reshape(N, K, L_out)
    else:
        idx = jnp.arange(ks)[:, None] + (jnp.arange(L_out) * stride)[None, :]   # (ks, L_out)
        patches = x[:, :, idx].reshape(N, K, L_out)
    patches = patches.astype(compute_dtype)
    w_mat = weight.reshape(C_out, K).astype(compute_dtype)

    # Length tile: whole L_out when it fits, otherwise a big lane-aligned tile (last block partial).
    TL = L_out if L_out <= tile_l else tile_l
    grid = (N, pl.cdiv(L_out, TL))

    patch_spec = pl.BlockSpec((1, K, TL), lambda n, j: (n, 0, j))
    w_spec = pl.BlockSpec((C_out, K), lambda n, j: (0, 0))
    col_spec = pl.BlockSpec((C_out, 1), lambda n, j: (0, 0))
    nstat_spec = pl.BlockSpec((1, C_out, 1), lambda n, j: (n, 0, 0))

    vmem_limit = 64 * 1024 * 1024

    # ---- Pass 1: per-(n, channel) batch statistics of the conv output -----------------------
    y_sum_n, y_sq_n = pl.pallas_call(
        functools.partial(_conv_stats_kernel, l_out=L_out),
        out_shape=(jax.ShapeDtypeStruct((N, C_out, 1), jnp.float32),
                   jax.ShapeDtypeStruct((N, C_out, 1), jnp.float32)),
        grid_spec=pltpu.PrefetchScalarGridSpec(
            num_scalar_prefetch=0,
            grid=grid,
            in_specs=[patch_spec, w_spec],
            out_specs=[nstat_spec, nstat_spec],
        ),
        compiler_params=pltpu.CompilerParams(
            dimension_semantics=("parallel", "arbitrary"),
            vmem_limit_bytes=vmem_limit),
    )(patches, w_mat)

    # ---- Tiny per-channel glue: hierarchical reduce over N, fold into scale + shift ----------
    y_sum = jnp.sum(y_sum_n[:, :, 0], axis=0)                  # (C_out,)
    y_sq = jnp.sum(y_sq_n[:, :, 0], axis=0)
    m_total = N * L_out
    mean_raw = y_sum / m_total
    var = jnp.maximum(y_sq / m_total - mean_raw * mean_raw, 0.0)
    scale = gamma * lax.rsqrt(var + eps)
    # z = ((conv + bias) - (mean_raw + bias)) * scale + beta  ==  conv*scale + (beta - mean_raw*scale)
    shift = beta - mean_raw * scale
    scale_col = scale.astype(jnp.float32).reshape(C_out, 1)
    shift_col = shift.astype(jnp.float32).reshape(C_out, 1)
    alpha_sc = jnp.asarray(alpha, jnp.float32).reshape(1, 1)

    # ---- Pass 2: recompute conv tiles, normalize + PReLU, write NCL output directly ----------
    out = pl.pallas_call(
        _norm_act_kernel,
        out_shape=jax.ShapeDtypeStruct((N, C_out, L_out), out_dtype),
        grid_spec=pltpu.PrefetchScalarGridSpec(
            num_scalar_prefetch=0,
            grid=grid,
            in_specs=[
                patch_spec, w_spec, col_spec, col_spec,
                pl.BlockSpec(memory_space=pltpu.MemorySpace.SMEM),   # PReLU alpha scalar
            ],
            out_specs=pl.BlockSpec((1, C_out, TL), lambda n, j: (n, 0, j)),
        ),
        compiler_params=pltpu.CompilerParams(
            dimension_semantics=("parallel", "parallel"),
            vmem_limit_bytes=vmem_limit),
    )(patches, w_mat, scale_col, shift_col, alpha_sc)

    return out


def _reference_forward(x, weight, bias, gamma, beta, alpha, *, stride, eps=1e-5):
    """Pure-JAX reference (Conv1d + train-mode BatchNorm1d + PReLU), all in f32."""
    y = lax.conv_general_dilated(
        x, weight, window_strides=(stride,), padding="VALID",
        dimension_numbers=("NCH", "OIH", "NCH"))
    y = y + bias[None, :, None]
    mean = jnp.mean(y, axis=(0, 2), keepdims=True)
    var = jnp.mean((y - mean) ** 2, axis=(0, 2), keepdims=True)
    z = (y - mean) * lax.rsqrt(var + eps)
    z = z * gamma[None, :, None] + beta[None, :, None]
    return jnp.where(z > 0, z, alpha.reshape(()) * z)


if __name__ == "__main__":
    # Module hyperparameters (consistent with SampCNNStrided's constructor).
    conv_in, conv_out, conv_ks, conv_stride = 4, 8, 3, 3

    key = jax.random.PRNGKey(0)
    kx, kw, kb, kx2, kx3 = jax.random.split(key, 5)

    fan_in = conv_in * conv_ks
    bound = 1.0 / (fan_in ** 0.5)
    weight = jax.random.uniform(kw, (conv_out, conv_in, conv_ks),
                                minval=-bound, maxval=bound, dtype=jnp.float32)
    bias = jax.random.uniform(kb, (conv_out,), minval=-bound, maxval=bound, dtype=jnp.float32)
    gamma = jnp.ones((conv_out,), jnp.float32)       # BatchNorm1d weight
    beta = jnp.zeros((conv_out,), jnp.float32)       # BatchNorm1d bias
    alpha = jnp.full((1,), 0.25, jnp.float32)        # PReLU default init

    # --- case 1: small input, single length tile per batch element (default bf16 MXU path) ---
    N1, L1 = 2, 48                                   # L_out = 16
    x1 = jax.random.normal(kx, (N1, conv_in, L1), dtype=jnp.float32)
    fwd_bf16 = jax.jit(functools.partial(sampcnn_strided_forward, stride=conv_stride))
    out1 = jax.block_until_ready(fwd_bf16(x1, weight, bias, gamma, beta, alpha))
    ref1 = _reference_forward(x1, weight, bias, gamma, beta, alpha, stride=conv_stride)
    assert out1.shape == (N1, conv_out, (L1 - conv_ks) // conv_stride + 1)
    assert jnp.allclose(out1, ref1, atol=5e-2, rtol=5e-2), float(jnp.max(jnp.abs(out1 - ref1)))

    # --- case 2: same input, f32 matmul path (tight numerical check) ---
    fwd_f32 = jax.jit(functools.partial(sampcnn_strided_forward, stride=conv_stride,
                                        compute_dtype=jnp.float32))
    out2 = jax.block_until_ready(fwd_f32(x1, weight, bias, gamma, beta, alpha))
    assert jnp.allclose(out2, ref1, atol=5e-3, rtol=5e-3), float(jnp.max(jnp.abs(out2 - ref1)))

    # --- case 3: longer input forcing multiple length tiles + last-tile-only masked stats ---
    N3, L3 = 2, 601                                  # L_out = 200; tile_l=128 -> 2 tiles/batch
    x3 = jax.random.normal(kx2, (N3, conv_in, L3), dtype=jnp.float32)
    fwd_tiled = jax.jit(functools.partial(sampcnn_strided_forward, stride=conv_stride,
                                          tile_l=128))
    out3 = jax.block_until_ready(fwd_tiled(x3, weight, bias, gamma, beta, alpha))
    ref3 = _reference_forward(x3, weight, bias, gamma, beta, alpha, stride=conv_stride)
    assert out3.shape == (N3, conv_out, 200)
    assert jnp.allclose(out3, ref3, atol=5e-2, rtol=5e-2), float(jnp.max(jnp.abs(out3 - ref3)))

    # --- case 4: stride < ks (overlapping windows) exercises the gather im2col fallback ---
    N4, L4, stride4 = 2, 33, 2                       # L_out = 16
    x4 = jax.random.normal(kx3, (N4, conv_in, L4), dtype=jnp.float32)
    fwd_s2 = jax.jit(functools.partial(sampcnn_strided_forward, stride=stride4))
    out4 = jax.block_until_ready(fwd_s2(x4, weight, bias, gamma, beta, alpha))
    ref4 = _reference_forward(x4, weight, bias, gamma, beta, alpha, stride=stride4)
    assert out4.shape == (N4, conv_out, 16)
    assert jnp.allclose(out4, ref4, atol=5e-2, rtol=5e-2), float(jnp.max(jnp.abs(out4 - ref4)))

    print("KERNEL_OK")
</pallas_src>

<mosaic_0001>
module attributes {stable_mosaic.version = 11 : i64} {
  func.func @_conv_stats_kernel(%arg0: i32, %arg1: i32, %arg2: memref<1x12x16xbf16, #tpu.memory_space<vmem>>, %arg3: memref<8x12xbf16, #tpu.memory_space<vmem>>, %arg4: memref<1x8x1xf32, #tpu.memory_space<vmem>>, %arg5: memref<1x8x1xf32, #tpu.memory_space<vmem>>) attributes {dimension_semantics = [#tpu.dimension_semantics<parallel>, #tpu.dimension_semantics<arbitrary>], iteration_bounds = array<i64: 2, 1>, scalar_prefetch = 0 : i64, scratch_operands = 0 : i64, tpu.core_type = #tpu.core_type<tc>, window_params = [{transform_indices = @transform_0, window_bounds = array<i64: 1, 12, 16>}, {pipeline_mode = #tpu.pipeline_mode<synchronous>, transform_indices = @transform_1, window_bounds = array<i64: 8, 12>}, {transform_indices = @transform_2, window_bounds = array<i64: 1, 8, 1>}, {transform_indices = @transform_3, window_bounds = array<i64: 1, 8, 1>}]} {
    %c0_i32 = arith.constant 0 : i32
    %0 = arith.cmpi eq, %arg1, %c0_i32 : i32
    %1 = arith.extui %0 : i1 to i32
    %c0_i32_0 = arith.constant 0 : i32
    %2 = arith.cmpi ne, %1, %c0_i32_0 : i32
    scf.if %2 {
      %cst_19 = arith.constant 0.000000e+00 : f32
      %24 = vector.broadcast %cst_19 : f32 to vector<1x8x1xf32>
      %c0_20 = arith.constant 0 : index
      %c0_21 = arith.constant 0 : index
      %c0_22 = arith.constant 0 : index
      %25 = vector.load %arg4[%c0_20, %c0_21, %c0_22] : memref<1x8x1xf32, #tpu.memory_space<vmem>>, vector<1x8x1xf32>
      tpu.vector_store %arg4[%c0_20, %c0_21, %c0_22], %24 {strides = array<i32>} : memref<1x8x1xf32, #tpu.memory_space<vmem>>, vector<1x8x1xf32>,
      %cst_23 = arith.constant 0.000000e+00 : f32
      %26 = vector.broadcast %cst_23 : f32 to vector<1x8x1xf32>
      %c0_24 = arith.constant 0 : index
      %c0_25 = arith.constant 0 : index
      %c0_26 = arith.constant 0 : index
      %27 = vector.load %arg5[%c0_24, %c0_25, %c0_26] : memref<1x8x1xf32, #tpu.memory_space<vmem>>, vector<1x8x1xf32>
      tpu.vector_store %arg5[%c0_24, %c0_25, %c0_26], %26 {strides = array<i32>} : memref<1x8x1xf32, #tpu.memory_space<vmem>>, vector<1x8x1xf32>,
    } else {
    }
    %c0 = arith.constant 0 : index
    %c0_1 = arith.constant 0 : index
    %3 = vector.load %arg3[%c0, %c0_1] : memref<8x12xbf16, #tpu.memory_space<vmem>>, vector<8x12xbf16>
    %c0_2 = arith.constant 0 : index
    %c0_3 = arith.constant 0 : index
    %c0_4 = arith.constant 0 : index
    %4 = vector.load %arg2[%c0_2, %c0_3, %c0_4] : memref<1x12x16xbf16, #tpu.memory_space<vmem>>, vector<1x12x16xbf16>
    %5 = vector.shape_cast %4 : vector<1x12x16xbf16> to vector<12x16xbf16>
    %cst = arith.constant dense<0.000000e+00> : vector<8x16xf32>
    %6 = tpu.matmul %3, %5, %cst {dimension_numbers = #tpu.dot_dimension_numbers<[1], [0], [0], [1], [0, 0, 1, 1], [], []>} : vector<8x12xbf16>, vector<12x16xbf16>, vector<8x16xf32> -> vector<8x16xf32>
    %c0_5 = arith.constant 0 : index
    %c0_6 = arith.constant 0 : index
    %c0_7 = arith.constant 0 : index
    %7 = vector.load %arg4[%c0_5, %c0_6, %c0_7] : memref<1x8x1xf32, #tpu.memory_space<vmem>>, vector<1x8x1xf32>
    %8 = vector.shape_cast %7 : vector<1x8x1xf32> to vector<8x1xf32>
    %cst_8 = arith.constant dense<0.000000e+00> : vector<8xf32>
    %9 = vector.multi_reduction <add>, %6, %cst_8 [1] : vector<8x16xf32> to vector<8xf32>
    %10 = vector.shape_cast %9 : vector<8xf32> to vector<8x1xf32>
    %11 = arith.addf %8, %10 : vector<8x1xf32>
    %c0_9 = arith.constant 0 : index
    %c0_10 = arith.constant 0 : index
    %c0_11 = arith.constant 0 : index
    %12 = vector.load %arg4[%c0_9, %c0_10, %c0_11] : memref<1x8x1xf32, #tpu.memory_space<vmem>>, vector<1x8x1xf32>
    %13 = vector.shape_cast %12 : vector<1x8x1xf32> to vector<8x1xf32>
    %14 = vector.shape_cast %11 : vector<8x1xf32> to vector<1x8x1xf32>
    tpu.vector_store %arg4[%c0_9, %c0_10, %c0_11], %14 {strides = array<i32>} : memref<1x8x1xf32, #tpu.memory_space<vmem>>, vector<1x8x1xf32>,
    %c0_12 = arith.constant 0 : index
    %c0_13 = arith.constant 0 : index
    %c0_14 = arith.constant 0 : index
    %15 = vector.load %arg5[%c0_12, %c0_13, %c0_14] : memref<1x8x1xf32, #tpu.memory_space<vmem>>, vector<1x8x1xf32>
    %16 = vector.shape_cast %15 : vector<1x8x1xf32> to vector<8x1xf32>
    %17 = arith.mulf %6, %6 : vector<8x16xf32>
    %cst_15 = arith.constant dense<0.000000e+00> : vector<8xf32>
    %18 = vector.multi_reduction <add>, %17, %cst_15 [1] : vector<8x16xf32> to vector<8xf32>
    %19 = vector.shape_cast %18 : vector<8xf32> to vector<8x1xf32>
    %20 = arith.addf %16, %19 : vector<8x1xf32>
    %c0_16 = arith.constant 0 : index
    %c0_17 = arith.constant 0 : index
    %c0_18 = arith.constant 0 : index
    %21 = vector.load %arg5[%c0_16, %c0_17, %c0_18] : memref<1x8x1xf32, #tpu.memory_space<vmem>>, vector<1x8x1xf32>
    %22 = vector.shape_cast %21 : vector<1x8x1xf32> to vector<8x1xf32>
    %23 = vector.shape_cast %20 : vector<8x1xf32> to vector<1x8x1xf32>
    tpu.vector_store %arg5[%c0_16, %c0_17, %c0_18], %23 {strides = array<i32>} : memref<1x8x1xf32, #tpu.memory_space<vmem>>, vector<1x8x1xf32>,
    return
  }
  func.func @transform_0(%arg0: i32, %arg1: i32) -> (i32, i32, i32) {
    %c0_i32 = arith.constant 0 : i32
    %c0_i32_0 = arith.constant 0 : i32
    return %arg0, %c0_i32, %arg1 : i32, i32, i32
  }
  func.func @transform_1(%arg0: i32, %arg1: i32) -> (i32, i32) {
    %c0_i32 = arith.constant 0 : i32
    %c0_i32_0 = arith.constant 0 : i32
    %c0_i32_1 = arith.constant 0 : i32
    return %c0_i32, %c0_i32_0 : i32, i32
  }
  func.func @transform_2(%arg0: i32, %arg1: i32) -> (i32, i32, i32) {
    %c0_i32 = arith.constant 0 : i32
    %c0_i32_0 = arith.constant 0 : i32
    %c0_i32_1 = arith.constant 0 : i32
    return %arg0, %c0_i32, %c0_i32_0 : i32, i32, i32
  }
  func.func @transform_3(%arg0: i32, %arg1: i32) -> (i32, i32, i32) {
    %c0_i32 = arith.constant 0 : i32
    %c0_i32_0 = arith.constant 0 : i32
    %c0_i32_1 = arith.constant 0 : i32
    return %arg0, %c0_i32, %c0_i32_0 : i32, i32, i32
  }
}

module attributes {stable_mosaic.version = 11 : i64} {
  func.func @_norm_act_kernel(%arg0: i32, %arg1: i32, %arg2: memref<1x12x16xbf16, #tpu.memory_space<vmem>>, %arg3: memref<8x12xbf16, #tpu.memory_space<vmem>>, %arg4: memref<8x1xf32, #tpu.memory_space<vmem>>, %arg5: memref<8x1xf32, #tpu.memory_space<vmem>>, %arg6: memref<1x1xf32, #tpu.memory_space<smem>>, %arg7: memref<1x8x16xf32, #tpu.memory_space<vmem>>) attributes {dimension_semantics = [#tpu.dimension_semantics<parallel>, #tpu.dimension_semantics<parallel>], iteration_bounds = array<i64: 2, 1>, scalar_prefetch = 0 : i64, scratch_operands = 0 : i64, tpu.core_type = #tpu.core_type<tc>, window_params = [{transform_indices = @transform_0, window_bounds = array<i64: 1, 12, 16>}, {pipeline_mode = #tpu.pipeline_mode<synchronous>, transform_indices = @transform_1, window_bounds = array<i64: 8, 12>}, {pipeline_mode = #tpu.pipeline_mode<synchronous>, transform_indices = @transform_2, window_bounds = array<i64: 8, 1>}, {pipeline_mode = #tpu.pipeline_mode<synchronous>, transform_indices = @transform_3, window_bounds = array<i64: 8, 1>}, {transform_indices = @transform_4, window_bounds = array<i64: 1, 1>}, {transform_indices = @transform_5, window_bounds = array<i64: 1, 8, 16>}]} {
    %c0 = arith.constant 0 : index
    %c0_0 = arith.constant 0 : index
    %0 = vector.load %arg3[%c0, %c0_0] : memref<8x12xbf16, #tpu.memory_space<vmem>>, vector<8x12xbf16>
    %c0_1 = arith.constant 0 : index
    %c0_2 = arith.constant 0 : index
    %c0_3 = arith.constant 0 : index
    %1 = vector.load %arg2[%c0_1, %c0_2, %c0_3] : memref<1x12x16xbf16, #tpu.memory_space<vmem>>, vector<1x12x16xbf16>
    %2 = vector.shape_cast %1 : vector<1x12x16xbf16> to vector<12x16xbf16>
    %cst = arith.constant dense<0.000000e+00> : vector<8x16xf32>
    %3 = tpu.matmul %0, %2, %cst {dimension_numbers = #tpu.dot_dimension_numbers<[1], [0], [0], [1], [0, 0, 1, 1], [], []>} : vector<8x12xbf16>, vector<12x16xbf16>, vector<8x16xf32> -> vector<8x16xf32>
    %c0_4 = arith.constant 0 : index
    %c0_5 = arith.constant 0 : index
    %4 = vector.load %arg4[%c0_4, %c0_5] : memref<8x1xf32, #tpu.memory_space<vmem>>, vector<8x1xf32>
    %5 = vector.broadcast %4 : vector<8x1xf32> to vector<8x16xf32>
    %6 = arith.mulf %3, %5 : vector<8x16xf32>
    %c0_6 = arith.constant 0 : index
    %c0_7 = arith.constant 0 : index
    %7 = vector.load %arg5[%c0_6, %c0_7] : memref<8x1xf32, #tpu.memory_space<vmem>>, vector<8x1xf32>
    %8 = vector.broadcast %7 : vector<8x1xf32> to vector<8x16xf32>
    %9 = arith.addf %6, %8 : vector<8x16xf32>
    %c0_8 = arith.constant 0 : index
    %c0_9 = arith.constant 0 : index
    %10 = memref.load %arg6[%c0_8, %c0_9] : memref<1x1xf32, #tpu.memory_space<smem>>
    %cst_10 = arith.constant 0.000000e+00 : f32
    %11 = vector.broadcast %cst_10 : f32 to vector<8x16xf32>
    %12 = arith.cmpf ogt, %9, %11 : vector<8x16xf32>
    %13 = vector.broadcast %10 : f32 to vector<8x16xf32>
    %14 = arith.mulf %13, %9 : vector<8x16xf32>
    %15 = arith.select %12, %9, %14 : vector<8x16xi1>, vector<8x16xf32>
    %c0_11 = arith.constant 0 : index
    %c0_12 = arith.constant 0 : index
    %c0_13 = arith.constant 0 : index
    %16 = vector.load %arg7[%c0_11, %c0_12, %c0_13] : memref<1x8x16xf32, #tpu.memory_space<vmem>>, vector<1x8x16xf32>
    %17 = vector.shape_cast %16 : vector<1x8x16xf32> to vector<8x16xf32>
    %18 = vector.shape_cast %15 : vector<8x16xf32> to vector<1x8x16xf32>
    tpu.vector_store %arg7[%c0_11, %c0_12, %c0_13], %18 {strides = array<i32>} : memref<1x8x16xf32, #tpu.memory_space<vmem>>, vector<1x8x16xf32>,
    return
  }
  func.func @transform_0(%arg0: i32, %arg1: i32) -> (i32, i32, i32) {
    %c0_i32 = arith.constant 0 : i32
    %c0_i32_0 = arith.constant 0 : i32
    return %arg0, %c0_i32, %arg1 : i32, i32, i32
  }
  func.func @transform_1(%arg0: i32, %arg1: i32) -> (i32, i32) {
    %c0_i32 = arith.constant 0 : i32
    %c0_i32_0 = arith.constant 0 : i32
    %c0_i32_1 = arith.constant 0 : i32
    return %c0_i32, %c0_i32_0 : i32, i32
  }
  func.func @transform_2(%arg0: i32, %arg1: i32) -> (i32, i32) {
    %c0_i32 = arith.constant 0 : i32
    %c0_i32_0 = arith.constant 0 : i32
    %c0_i32_1 = arith.constant 0 : i32
    return %c0_i32, %c0_i32_0 : i32, i32
  }
  func.func @transform_3(%arg0: i32, %arg1: i32) -> (i32, i32) {
    %c0_i32 = arith.constant 0 : i32
    %c0_i32_0 = arith.constant 0 : i32
    %c0_i32_1 = arith.constant 0 : i32
    return %c0_i32, %c0_i32_0 : i32, i32
  }
  func.func @transform_4(%arg0: i32, %arg1: i32) -> (i32, i32) {
    %c0_i32 = arith.constant 0 : i32
    %c0_i32_0 = arith.constant 0 : i32
    %c0_i32_1 = arith.constant 0 : i32
    return %c0_i32, %c0_i32_0 : i32, i32
  }
  func.func @transform_5(%arg0: i32, %arg1: i32) -> (i32, i32, i32) {
    %c0_i32 = arith.constant 0 : i32
    %c0_i32_0 = arith.constant 0 : i32
    return %arg0, %c0_i32, %arg1 : i32, i32, i32
  }
}

</mosaic_0001>

<bundles_post_ra>
// kernel: sampcnn_strided_forward.3
= control target key start
LH: loop header
LB: loop body
LE: loop exit
PB: predicated region body
PF: predicated region fallthrough
CT: control target
= control target key end

     0   :  { %s1161_s0 = inlined_call_operand.hbm [shape: bf16[2,12,16], index: 0, kind: input, shape index: {}]   ;;  %s1162_s1 = inlined_call_operand.hbm [shape: bf16[8,12], index: 1, kind: input, shape index: {}]   ;;  %s1163_s2 = inlined_call_operand.hbm [shape: f32[8,1], index: 2, kind: input, shape index: {}]   ;;  %s1164_s3 = inlined_call_operand.hbm [shape: f32[8,1], index: 3, kind: input, shape index: {}]   ;;  %s1165_s4 = inlined_call_operand.<no memory space> [shape: f32[1,1], index: 4, kind: input, shape index: {}]   ;;  %s1166_s5 = inlined_call_operand.hbm [shape: f32[2,8,16], index: 5, kind: output, shape index: {}]  }
   0x1   :  { %10 = sst [smem:[#allocation2]] %s1165_s4 }
   0x2   :  { %11 = vsyncpa [#allocation4], 0 }
   0x3   :  { %13 = vsyncpa [#allocation4 + $0x1], 0 }
   0x4   :  { %14 = vsyncpa [#allocation7], 0 }
   0x5   :  { %15 = vsyncpa [#allocation10], 0 }
   0x6   :  { %16 = vsyncpa [#allocation5], 0 }
   0x7   :  { %18 = vsyncpa [#allocation5 + $0x1], 0  ;;  %s882_s20 = smov 0   ;;  %s884_s21 = smov 0  }
   0x8   :  { %s886_s22 = smov 0   ;;  %s888_s23 = smov 0  }
   0x9   :  { %s890_s24 = smov 0   ;;  %s892_s25 = smov 0  }
   0xa LB: > { %s502_s4 = sadd.s32 4294967295, %s837_s25   ;;  %s503_s26 = sadd.s32 4294967294, %s837_s25   ;;  %s837_s25 = sphi %s892_s25, %s24_s25   ;;  %s833_s24 = sphi %s890_s24, %s1190_s24   ;;  %s829_s23 = sphi %s888_s23, %s1189_s23   ;;  %s825_s22 = sphi %s886_s22, %s1188_s22   ;;  %s821_s21 = sphi %s884_s21, %s1187_s21   ;;  %s817_s20 = sphi %s882_s20, %s1186_s20  }
   0xb   : > { %p58_p0 = scmp.ne.s32.totalorder %s821_s21, %s817_s20  ;;  %p916_p1 = scmp.eq.s32.totalorder %s502_s4, 0 }
   0xc   : > { %p920_p2 = scmp.eq.s32.totalorder %s502_s4, 1  ;;  %p174_p3 = scmp.eq.s32.totalorder %s503_s26, 1 }
   0xd   : > { %s1171_s27 = scalar_select %p916_p1, 1, 0 }
   0xe   : > { %s1172_s28 = scalar_select %p920_p2, 1, 0 }
   0xf   : > { %p926_p4 = por %p916_p1, %p58_p0  ;;  %p504_p5 = scmp.ge.s32.totalorder %s837_s25, 1 }
  0x10   : > { %p931_p6 = por %p174_p3, %p58_p0  ;;  %p181_p7 = scmp.lt.s32.totalorder %s837_s25, 3 }
  0x11   : > { %s1173_s29 = scalar_select %p926_p4, 1, 0 }
  0x12   : > { %s1174_s30 = scalar_select %p931_p6, 1, 0 }
  0x13   : > { %p936_p8 = pnand %p504_p5, %p181_p7  ;;  %s839_s7 = smov [#allocation6]  }
  0x14   : > { %s194_s8 = sshll.u32 %s839_s7, 4  ;;  %s840_s9 = smov [#allocation8]   ;;  %s195_s8 = int_to_ptr.vmem [resolvable:$true] %s194_s8 }
  0x15   : > { %s1175_s6 = scalar_select %p936_p8, 1, 0 }
  0x16   : > { %p549_p10 = pneg %p936_p8  ;;  %s205_s10 = sshll.u32 %s840_s9, 4  ;;  %s949_s10 = int_to_ptr.vmem [resolvable:$true] %s205_s10 }
  0x17   : > { %s841_s12 = smov [#allocation9]   ;;  %s633_s16 = scalar_lea.hbm %s1162_s1, 64 }
  0x18   : > { %p945_p11 = pnand %p549_p10, %p916_p1  ;;  %s216_s13 = sshll.u32 %s841_s12, 4  ;;  %s951_s13 = int_to_ptr.vmem [resolvable:$true] %s216_s13 }
  0x19   : > { %p634_p12 = scmp.ne.s32.totalorder %s1162_s1, %s633_s16  ;;  %p640_p5 = scmp.lt.u32.totalorder %s633_s16, %s1162_s1 }
  0x1a   : > { %p961_p13 = pneg %p945_p11 }
  0x1c   : > { %p636_p0 = pnand %p961_p13, %p634_p12 }
  0x1e   : > { %p637_p3 = pneg %p636_p0 }
  0x20   : > { %p642_p7 = pnand %p640_p5, %p637_p3 }
  0x22   : > { %645 = shalt.err (!%p642_p7)
}
  0x23   : > { %s646_s7 = scalar_lea.vmem %s195_s8, 64  ;;  %p654_p1 = scmp.lt.s32.totalorder %s195_s8, %s195_s8 }
  0x24   : > { %p647_p10 = scmp.ne.s32.totalorder %s195_s8, %s646_s7  ;;  %p655_p4 = scmp.lt.s32.totalorder %s646_s7, %s646_s7 }
  0x26   : > { %p649_p9 = pnand %p647_p10, %p961_p13  ;;  %p656_p8 = por %p655_p4, %p654_p1 }
  0x28   : > { %p650_p6 = pneg %p649_p9 }
  0x2a   : > { %p657_p2 = pnand %p656_p8, %p650_p6 }
  0x2c   : > { %660 = shalt.err (!%p657_p2)
}
  0x2d   : > { %552 = dma.hbm_to_vmem [thread:$0]  (!%p945_p11), %s1162_s1, 64, %s195_s8, [#allocation7]  }
  0x2e   : > { %s661_s16 = scalar_lea.hbm %s1163_s2, 128 }
  0x2f   : > { %p662_p9 = scmp.ne.s32.totalorder %s1163_s2, %s661_s16  ;;  %p668_p2 = scmp.lt.u32.totalorder %s661_s16, %s1163_s2 }
  0x31   : > { %p664_p12 = pnand %p662_p9, %p961_p13 }
  0x33   : > { %p665_p1 = pneg %p664_p12 }
  0x35   : > { %p670_p4 = pnand %p668_p2, %p665_p1 }
  0x37   : > { %673 = shalt.err (!%p670_p4)
}
  0x38   : > { %s674_s8 = scalar_lea.vmem %s949_s10, 128  ;;  %p682_p3 = scmp.lt.s32.totalorder %s949_s10, %s949_s10 }
  0x39   : > { %p675_p6 = scmp.ne.s32.totalorder %s949_s10, %s674_s8  ;;  %p683_p5 = scmp.lt.s32.totalorder %s674_s8, %s674_s8 }
  0x3b   : > { %p677_p8 = pnand %p675_p6, %p961_p13  ;;  %p684_p7 = por %p683_p5, %p682_p3 }
  0x3d   : > { %p678_p0 = pneg %p677_p8 }
  0x3f   : > { %p685_p10 = pnand %p684_p7, %p678_p0 }
  0x41   : > { %688 = shalt.err (!%p685_p10)
}
  0x42   : > { %555 = dma.hbm_to_vmem [thread:$0]  (!%p945_p11), %s1163_s2, 128, %s949_s10, [#allocation7]  }
  0x43   : > { %s689_s15 = scalar_lea.hbm %s1164_s3, 128 }
  0x44   : > { %p690_p9 = scmp.ne.s32.totalorder %s1164_s3, %s689_s15  ;;  %p696_p2 = scmp.lt.u32.totalorder %s689_s15, %s1164_s3 }
  0x46   : > { %p692_p12 = pnand %p690_p9, %p961_p13 }
  0x48   : > { %p693_p1 = pneg %p692_p12 }
  0x4a   : > { %p698_p4 = pnand %p696_p2, %p693_p1 }
  0x4c   : > { %701 = shalt.err (!%p698_p4)
}
  0x4d   : > { %s702_s10 = scalar_lea.vmem %s951_s13, 128  ;;  %p710_p3 = scmp.lt.s32.totalorder %s951_s13, %s951_s13 }
  0x4e   : > { %p703_p6 = scmp.ne.s32.totalorder %s951_s13, %s702_s10  ;;  %p711_p5 = scmp.lt.s32.totalorder %s702_s10, %s702_s10 }
  0x50   : > { %p705_p8 = pnand %p703_p6, %p961_p13  ;;  %p712_p7 = por %p711_p5, %p710_p3 }
  0x52   : > { %p706_p0 = pneg %p705_p8 }
  0x54   : > { %p713_p10 = pnand %p712_p7, %p706_p0 }
  0x56   : > { %716 = shalt.err (!%p713_p10)
}
  0x57   : > { %558 = dma.hbm_to_vmem [thread:$0]  (!%p945_p11), %s1164_s3, 128, %s951_s13, [#allocation10]  }
  0x58   : > { %s45_s19 = sadd.s32 1, %s825_s22  ;;  %s36_s7 = sadd.s32 1, %s833_s24 }
  0x59   : > { %p52_p13 = scmp.ne.s32.totalorder %s825_s22, %s821_s21  ;;  %p38_p9 = scmp.ge.s32.totalorder %s36_s7, 2 }
  0x5a   : > { %p53_p12 = scmp.eq.s32.totalorder %s837_s25, 0  ;;  %p1178_p1 = scmp.ne.s32.totalorder %s1172_s28, 0 }
  0x5b   : > { %p570_p4 = scmp.lt.s32.totalorder %s837_s25, 2  ;;  %s1192_s7 = smov (%p38_p9, %s36_s7), 0 }
  0x5c   : > { %p1030_p2 = por %p1178_p1, %p52_p13  ;;  %p54_p6 = por %p53_p12, %p52_p13 }
  0x5d   : > { %s230_s9 = sand.u32 1, %s825_s22   ;;  %s40_s12 = ssub.s32 %s833_s24, %s1192_s7 }
  0x5e   : > { %p43_p8 = scmp.eq.s32.totalorder %s40_s12, 0  ;;  %s509_s13 = sshll.u32 %s230_s9, 3 }
  0x5f   : > { %s524_s14 = sshll.u32 %s833_s24, 7  ;;  %s234_s18 = scalar_lea.vmem [#allocation3], %s509_s13 }
  0x60   : > { %s1042_s15 = scalar_select %p43_p8, %s825_s22, %s45_s19  }
  0x61   : > { %s1047_s28 = scalar_lea.hbm %s1161_s0, %s524_s14  ;;  %s242_s4 = sshll.u32 %s234_s18, 4  ;;  %s1049_s4 = int_to_ptr.vmem [resolvable:$true] %s242_s4 }
  0x62   : > { %p1053_p11 = pnand %p570_p4, %p54_p6  ;;  %s1057_s26 = scalar_lea.sflag [#allocation4], %s230_s9 }
  0x63   : > { %s717_s8 = scalar_lea.hbm %s1047_s28, 128  ;;  %s722_s13 = scalar_lea.hbm %s1161_s0, 256 }
  0x64   : > { %p718_p0 = scmp.ne.s32.totalorder %s1047_s28, %s717_s8  ;;  %p719_p3 = pneg %p1053_p11 }
  0x65   : > { %p723_p10 = scmp.lt.u32.totalorder %s1047_s28, %s1161_s0  ;;  %p724_p13 = scmp.lt.u32.totalorder %s722_s13, %s717_s8 }
  0x66   : > { %p720_p5 = pnand %p719_p3, %p718_p0  ;;  %p726_p12 = scmp.lt.u32.totalorder %s717_s8, %s1047_s28 }
  0x67   : > { %p725_p9 = por %p724_p13, %p723_p10 }
  0x68   : > { %p721_p7 = pneg %p720_p5 }
  0x69   : > { %p727_p1 = por %p726_p12, %p725_p9 }
  0x6b   : > { %p728_p4 = pnand %p727_p1, %p721_p7 }
  0x6d   : > { %731 = shalt.err (!%p728_p4)
}
  0x6e   : > { %s732_s9 = scalar_lea.vmem %s1049_s4, 128  ;;  %s842_s17 = smov [#allocation3]  }
  0x6f   : > { %p733_p6 = scmp.ne.s32.totalorder %s1049_s4, %s732_s9  ;;  %s737_s18 = sshll.u32 %s842_s17, 4  ;;  %s738_s18 = int_to_ptr.vmem [resolvable:$false] %s737_s18 }
  0x70   : > { %s739_s19 = scalar_lea.vmem %s738_s18, 256  ;;  %p740_p5 = scmp.lt.s32.totalorder %s1049_s4, %s738_s18 }
  0x71   : > { %p735_p8 = pnand %p733_p6, %p719_p3  ;;  %p741_p10 = scmp.lt.s32.totalorder %s739_s19, %s732_s9 }
  0x73   : > { %p736_p0 = pneg %p735_p8  ;;  %p742_p13 = por %p741_p10, %p740_p5 }
  0x75   : > { %p743_p9 = pnand %p742_p13, %p736_p0 }
  0x77   : > { %746 = shalt.err (!%p743_p9)
}
  0x78   : > { %s843_s8 = smov 64   ;;  %s844_s12 = smov 4  }
  0x79   : > { %562 = dma.hbm_to_vmem [thread:$0]  (!%p1053_p11), %s1047_s28, 128, %s1049_s4, %s1057_s26, %s843_s8, %s843_s8, %s844_s12  }
  0x7a   : > { %p1181_p3 = scmp.ne.s32.totalorder %s1175_s6, 0 }
  0x7b   : > { %s1088_s13 = sand.u32 (!%p1181_p3), 1, %s821_s21   ;;  %p1182_p7 = scmp.ne.s32.totalorder (!%p1181_p3), %s1173_s29, 0 }
  0x7c   : > { %254 = sbr.rel (%p1181_p3) target bundleno = 376 (0x178), region = 40  ;;  %s513_s14 = sshll.u32 (!%p1181_p3), %s1088_s13, 3 }
  0x7d   : > { %s257_s16 = scalar_lea.sflag (!%p1181_p3), [#allocation4], %s1088_s13  ;;  %s260_s9 = scalar_lea.vmem (!%p1181_p3), [#allocation3], %s513_s14 }
  0x83   : > { %800 = dma.done.wait (%p1182_p7), %s257_s16, 128  }
  0x84   : > { %802 = vsyncadd (%p1182_p7), %s257_s16, 4294967168  ;;  %p1183_p11 = scmp.ne.s32.totalorder %s1171_s27, 0 }
  0x86   : > { %804 = dma.done.wait (%p1183_p11), [#allocation7], 192  }
  0x87   : > { %806 = vsyncadd (%p1183_p11), [#allocation7], 4294967104 }
  0x88   : > { %808 = dma.done.wait (%p1183_p11), [#allocation10], 128  }
  0x89   : > { %810 = vsyncadd (%p1183_p11), [#allocation10], 4294967168  ;;  %v845_v0 = vmov 0.0   ;;  %vm846_vm0 = vmmov 0   ;;  %v847_v1 = vmov 0   ;;  %vm312_vm1 = vcmask 1045504  }
  0x8a   : > { %527 = vmatprep.subr.bf16.mxu0 %v845_v0  ;;  %529 = vmatprep.mubr.msk.bf16.mxu0 %vm846_vm0, %v845_v0  ;;  %v632_v2 = vld [vmem:[%s260_s9] sm:$0x3f]   ;;  %v356_v3 = vld [vmem:[#allocation8] sm:$0xff]  ;;  %v300_v5 = vld [vmem:[#allocation6] sm:$0xf]  ;;  %vm308_vm2 = vcmask 97280  }
  0x8b   : > { %631 = vset.pattern.permute.xlu0 %v847_v1  ;;  %v314_v4 = vsel %vm312_vm1, %v632_v2, 0  ;;  %v363_v6 = vld [vmem:[#allocation9] sm:$0xff]  ;;  %s370_s27 = sld [smem:[#allocation2]]  ;;  %s521_s29 = sshll.u32 %s829_s23, 7  ;;  %vm375_vm4 = vcmask 130048  }
  0x8c   : > { %359 = vperm.xlu0 %631, %v356_v3   ;;  %528 = vmatpush3.bf16.msra.mxu0 %v314_v4  ;;  %s298_s6 = scalar_lea.vmem [#allocation11], %s513_s14  ;;  %s1112_s26 = scalar_lea.hbm %s1166_s5, %s521_s29 }
  0x8d   : > { %s392_s28 = sshll.u32 %s298_s6, 4  ;;  %s378_s17 = scalar_lea.sflag [#allocation5], %s1088_s13  ;;  %s1114_s28 = int_to_ptr.vmem [resolvable:$true] %s392_s28 }
  0x8e   : > { %s747_s23 = scalar_lea.vmem %s1114_s28, 128  ;;  %s848_s18 = smov [#allocation11]  }
  0x8f   : > { %530 = vmatmul.mubr.msk.bf16.vlgmr.msra.gmra.mrb[0].mxu0 %vm308_vm2, %v300_v5  ;;  %p748_p12 = scmp.ne.s32.totalorder %s1114_s28, %s747_s23  ;;  %s751_s19 = sshll.u32 %s848_s18, 4  ;;  %s752_s19 = int_to_ptr.vmem [resolvable:$false] %s751_s19 }
  0x90   : > { %366 = vperm.xlu0 %631, %v363_v6   ;;  %s753_s8 = scalar_lea.vmem %s752_s19, 256  ;;  %p754_p6 = scmp.lt.s32.totalorder %s1114_s28, %s752_s19 }
  0x91   : > { %v372_v12 = vstv %s370_s27  ;;  %p749_p1 = pnand %p748_p12, %p1030_p2  ;;  %p755_p8 = scmp.lt.s32.totalorder %s753_s8, %s747_s23 }
  0x93   : > { %p750_p4 = pneg %p749_p1  ;;  %p756_p0 = por %p755_p8, %p754_p6 }
  0x95   : > { %p757_p5 = pnand %p756_p0, %p750_p4 }
 0x10b   : > { %v360_v7 = vpop.permute.xlu0 %359 }
 0x10f   : > { %v367_v11 = vpop.permute.xlu0 %366 }
 0x162   : > { %v350_v8 = vpop.f32.mrb[0].mxu0 }
 0x163   : > { %v362_v9 = vmul.f32 %v360_v7, %v350_v8  ;;  %v531_v10 = vpop.f32.mrb[1].mxu0 }
 0x164   : > { %v353_v13 = vpop.f32.mrb[2].mxu0 }
 0x165   : > { %v369_v14 = vadd.f32 %v367_v11, %v362_v9  ;;  %v532_v15 = vpop.f32.mrb[3].mxu0 }
 0x167   : > { %vm371_vm3 = vcmp.gt.f32.partialorder %v369_v14, 0.0  ;;  %v373_v16 = vmul.f32 %v372_v12, %v369_v14 }
 0x169   : > { %v374_v17 = vsel %vm371_vm3, %v369_v14, %v373_v16 }
 0x16a   : > { %376 = vst.msk [vmem:[%s298_s6] sm:$0xff] %vm375_vm4, %v374_v17 }
 0x16b   : > { %760 = shalt.err (!%p757_p5)
}
 0x16c   : > { %s761_s12 = scalar_lea.hbm %s1112_s26, 128  ;;  %s765_s16 = scalar_lea.hbm %s1166_s5, 256 }
 0x16d   : > { %p762_p10 = scmp.ne.s32.totalorder %s1112_s26, %s761_s12  ;;  %p766_p3 = scmp.lt.u32.totalorder %s1112_s26, %s1166_s5 }
 0x16e   : > { %p767_p7 = scmp.lt.u32.totalorder %s765_s16, %s761_s12  ;;  %p769_p12 = scmp.lt.u32.totalorder %s761_s12, %s1112_s26 }
 0x16f   : > { %p763_p13 = pnand %p762_p10, %p1030_p2 }
 0x170   : > { %p768_p11 = por %p767_p7, %p766_p3 }
 0x171   : > { %p764_p9 = pneg %p763_p13 }
 0x172   : > { %p770_p1 = por %p769_p12, %p768_p11 }
 0x174   : > { %p771_p4 = pnand %p770_p1, %p764_p9 }
 0x176   : > { %774 = shalt.err (!%p771_p4)
}
 0x177   : > { %547 = dma.vmem_to_hbm [thread:$0]  (%p1030_p2), %s1114_s28, 128, %s1112_s26, %s378_s17  }
 0x178 PF: > { %s404_s29 = sand.u32 1, %s817_s20   ;;  %p1184_p6 = scmp.ne.s32.totalorder %s1174_s30, 0 }
 0x179   : > { %p1185_p8 = scmp.ge.s32.totalorder %s837_s25, 2  ;;  %s405_s6 = scalar_lea.sflag [#allocation5], %s404_s29 }
 0x17b   : > { %p564_p0 = pnand %p1185_p8, %p1184_p6 }
 0x17d   : > { %812 = dma.done.wait (!%p564_p0), %s405_s6, 128  }
 0x17e   : > { %814 = vsyncadd (!%p564_p0), %s405_s6, 4294967168  ;;  %s24_s25 = sadd.s32 1, %s837_s25   ;;  %s1186_s20 = smov %s821_s21 }
 0x17f   : > { %p21_p5 = scmp.ge.s32.totalorder %s24_s25, 4   ;;  %s1187_s21 = smov %s825_s22 }
 0x180   : > { %s1188_s22 = smov %s1042_s15  ;;  %s1189_s23 = smov %s833_s24 }
 0x181   : > { %s1190_s24 = smov %s1192_s7  ;;  %23 = sbr.rel (!%p21_p5) target bundleno = 10 (0xa), region = 97 }
 0x188   :  { %410 = vsyncpa [#allocation4], 1 }
 0x189   :  { %412 = vsyncpa [#allocation4 + $0x1], 1 }
 0x18a   :  { %413 = vsyncpa [#allocation7], 1 }
 0x18b   :  { %414 = vsyncpa [#allocation10], 1 }
 0x18c   :  { %415 = vsyncpa [#allocation5], 1 }
 0x18d   :  { %417 = vsyncpa [#allocation5 + $0x1], 1 }

// kernel: sampcnn_strided_forward.2
= control target key start
LH: loop header
LB: loop body
LE: loop exit
PB: predicated region body
PF: predicated region fallthrough
CT: control target
= control target key end

     0   :  { %9 = vsyncpa [#allocation3], 0  ;;  %s1049_s0 = inlined_call_operand.hbm [shape: bf16[2,12,16], index: 0, kind: input, shape index: {}]   ;;  %s1050_s1 = inlined_call_operand.hbm [shape: bf16[8,12], index: 1, kind: input, shape index: {}]   ;;  %s1051_s2 = inlined_call_operand.hbm [shape: f32[2,8,1], index: 2, kind: output, shape index: {0}]   ;;  %s1052_s3 = inlined_call_operand.hbm [shape: f32[2,8,1], index: 3, kind: output, shape index: {1}]  }
   0x1   :  { %11 = vsyncpa [#allocation3 + $0x1], 0 }
   0x2   :  { %12 = vsyncpa [#allocation6], 0 }
   0x3   :  { %13 = vsyncpa [#allocation4], 0 }
   0x4   :  { %15 = vsyncpa [#allocation4 + $0x1], 0 }
   0x5   :  { %16 = vsyncpa [#allocation9], 0 }
   0x6   :  { %18 = vsyncpa [#allocation9 + $0x1], 0  ;;  %s780_s12 = smov 0   ;;  %s782_s13 = smov 0  }
   0x7   :  { %s784_s14 = smov 0   ;;  %s786_s15 = smov 0  }
   0x8   :  { %s788_s16 = smov 0   ;;  %s790_s17 = smov 0  }
   0x9 LB: > { %s461_s18 = sadd.s32 4294967295, %s750_s17   ;;  %s462_s19 = sadd.s32 4294967294, %s750_s17   ;;  %s750_s17 = sphi %s790_s17, %s24_s17   ;;  %s746_s16 = sphi %s788_s16, %s1080_s16   ;;  %s742_s15 = sphi %s786_s15, %s1079_s15   ;;  %s738_s14 = sphi %s784_s14, %s1078_s14   ;;  %s734_s13 = sphi %s782_s13, %s1077_s13   ;;  %s730_s12 = sphi %s780_s12, %s1076_s12  }
   0xa   : > { %s45_s20 = sadd.s32 1, %s738_s14  ;;  %p52_p0 = scmp.ne.s32.totalorder %s738_s14, %s734_s13 }
   0xb   : > { %p53_p1 = scmp.eq.s32.totalorder %s750_s17, 0  ;;  %p58_p2 = scmp.ne.s32.totalorder %s734_s13, %s730_s12 }
   0xc   : > { %p818_p3 = scmp.eq.s32.totalorder %s461_s18, 0  ;;  %p103_p4 = scmp.eq.s32.totalorder %s461_s18, 1 }
   0xd   : > { %p822_p5 = por %p53_p1, %p52_p0  ;;  %p109_p6 = scmp.eq.s32.totalorder %s462_s19, 1 }
   0xe   : > { %s1059_s21 = scalar_select %p818_p3, 1, 0 }
   0xf   : > { %p828_p7 = por %p818_p3, %p58_p2  ;;  %p832_p8 = por %p103_p4, %p52_p0 }
  0x10   : > { %p836_p9 = por %p109_p6, %p58_p2  ;;  %p463_p10 = scmp.ge.s32.totalorder %s750_s17, 1 }
  0x11   : > { %s1061_s23 = scalar_select %p828_p7, 1, 0 }
  0x12   : > { %s1062_s24 = scalar_select %p832_p8, 1, 0 }
  0x13   : > { %s1063_s25 = scalar_select %p836_p9, 1, 0 }
  0x14   : > { %p142_p11 = scmp.lt.s32.totalorder %s750_s17, 3  ;;  %s752_s27 = smov [#allocation5]  }
  0x15   : > { %s155_s28 = sshll.u32 %s752_s27, 4  ;;  %p517_p1 = scmp.lt.s32.totalorder %s750_s17, 2  ;;  %s156_s28 = int_to_ptr.vmem [resolvable:$true] %s155_s28 }
  0x16   : > { %p843_p13 = pnand %p463_p10, %p142_p11  ;;  %s36_s4 = sadd.s32 1, %s746_s16 }
  0x17   : > { %p852_p4 = pnand %p517_p1, %p822_p5  ;;  %p863_p6 = scmp.ge.s32.totalorder %s36_s4, 2 }
  0x18   : > { %s1064_s26 = scalar_select %p843_p13, 1, 0 }
  0x19   : > { %p501_p0 = pneg %p843_p13  ;;  %s166_s6 = sand.u32 1, %s738_s14  }
  0x1a   : > { %s1065_s29 = scalar_select %p852_p4, 1, 0 }
  0x1b   : > { %p858_p2 = pnand %p501_p0, %p818_p3  ;;  %s574_s9 = scalar_lea.hbm %s1050_s1, 64 }
  0x1c   : > { %s1067_s5 = scalar_select %p863_p6, 1, 0 }
  0x1d   : > { %p575_p5 = scmp.ne.s32.totalorder %s1050_s1, %s574_s9  ;;  %p576_p10 = pneg %p858_p2 }
  0x1e   : > { %p581_p0 = scmp.lt.u32.totalorder %s574_s9, %s1050_s1 }
  0x1f   : > { %p577_p11 = pnand %p576_p10, %p575_p5 }
  0x21   : > { %p578_p1 = pneg %p577_p11 }
  0x23   : > { %p583_p12 = pnand %p581_p0, %p578_p1 }
  0x25   : > { %586 = shalt.err (!%p583_p12)
}
  0x26   : > { %s587_s22 = scalar_lea.vmem %s156_s28, 64  ;;  %p595_p7 = scmp.lt.s32.totalorder %s156_s28, %s156_s28 }
  0x27   : > { %p588_p9 = scmp.ne.s32.totalorder %s156_s28, %s587_s22  ;;  %p596_p13 = scmp.lt.s32.totalorder %s587_s22, %s587_s22 }
  0x29   : > { %p590_p8 = pnand %p588_p9, %p576_p10  ;;  %p597_p4 = por %p596_p13, %p595_p7 }
  0x2b   : > { %p591_p3 = pneg %p590_p8 }
  0x2d   : > { %p598_p6 = pnand %p597_p4, %p591_p3 }
  0x2f   : > { %601 = shalt.err (!%p598_p6)
}
  0x30   : > { %504 = dma.hbm_to_vmem [thread:$0]  (!%p858_p2), %s1050_s1, 64, %s156_s28, [#allocation6]  }
  0x31   : > { %p1068_p9 = scmp.ne.s32.totalorder %s1067_s5, 0  ;;  %s466_s8 = sshll.u32 %s166_s6, 3 }
  0x32   : > { %s482_s10 = sshll.u32 %s746_s16, 7  ;;  %s170_s19 = scalar_lea.vmem [#allocation2], %s466_s8 }
  0x33   : > { %s1082_s4 = smov (%p1068_p9, %s36_s4), 0  ;;  %s894_s18 = scalar_lea.hbm %s1049_s0, %s482_s10 }
  0x34   : > { %s40_s9 = ssub.s32 %s746_s16, %s1082_s4  ;;  %s178_s22 = sshll.u32 %s170_s19, 4  ;;  %s901_s22 = int_to_ptr.vmem [resolvable:$true] %s178_s22 }
  0x35   : > { %p43_p3 = scmp.eq.s32.totalorder %s40_s9, 0  ;;  %s903_s5 = scalar_lea.sflag [#allocation3], %s166_s6 }
  0x36   : > { %s602_s27 = scalar_lea.hbm %s894_s18, 128  ;;  %p1069_p8 = scmp.ne.s32.totalorder %s1065_s29, 0 }
  0x37   : > { %s899_s28 = scalar_select %p43_p3, %s738_s14, %s45_s20  }
  0x38   : > { %p603_p7 = scmp.ne.s32.totalorder %s894_s18, %s602_s27  ;;  %p604_p12 = pneg %p1069_p8 }
  0x39   : > { %s607_s8 = scalar_lea.hbm %s1049_s0, 256  ;;  %p608_p2 = scmp.lt.u32.totalorder %s894_s18, %s1049_s0 }
  0x3a   : > { %p605_p13 = pnand %p604_p12, %p603_p7  ;;  %p609_p6 = scmp.lt.u32.totalorder %s607_s8, %s602_s27 }
  0x3b   : > { %p611_p10 = scmp.lt.u32.totalorder %s602_s27, %s894_s18 }
  0x3c   : > { %p606_p4 = pneg %p605_p13  ;;  %p610_p5 = por %p609_p6, %p608_p2 }
  0x3e   : > { %p612_p11 = por %p611_p10, %p610_p5 }
  0x40   : > { %p613_p1 = pnand %p612_p11, %p606_p4 }
  0x42   : > { %616 = shalt.err (!%p613_p1)
}
  0x43   : > { %s617_s20 = scalar_lea.vmem %s901_s22, 128  ;;  %s753_s6 = smov [#allocation2]  }
  0x44   : > { %p618_p0 = scmp.ne.s32.totalorder %s901_s22, %s617_s20  ;;  %s622_s11 = sshll.u32 %s753_s6, 4  ;;  %s623_s11 = int_to_ptr.vmem [resolvable:$false] %s622_s11 }
  0x45   : > { %s624_s19 = scalar_lea.vmem %s623_s11, 256  ;;  %p625_p7 = scmp.lt.s32.totalorder %s901_s22, %s623_s11 }
  0x46   : > { %p620_p9 = pnand %p618_p0, %p604_p12  ;;  %p626_p13 = scmp.lt.s32.totalorder %s624_s19, %s617_s20 }
  0x48   : > { %p621_p3 = pneg %p620_p9  ;;  %p627_p2 = por %p626_p13, %p625_p7 }
  0x4a   : > { %p628_p6 = pnand %p627_p2, %p621_p3 }
  0x4c   : > { %631 = shalt.err (!%p628_p6)
}
  0x4d   : > { %s754_s27 = smov 64   ;;  %s755_s7 = smov 4  }
  0x4e   : > { %508 = dma.hbm_to_vmem [thread:$0]  (!%p1069_p8), %s894_s18, 128, %s901_s22, %s903_s5, %s754_s27, %s754_s27, %s755_s7  }
  0x4f   : > { %p1070_p12 = scmp.ne.s32.totalorder %s1064_s26, 0 }
  0x50   : > { %s934_s9 = sand.u32 (!%p1070_p12), 1, %s734_s13   ;;  %p1071_p4 = scmp.ne.s32.totalorder (!%p1070_p12), %s1061_s23, 0 }
  0x51   : > { %190 = sbr.rel (%p1070_p12) target bundleno = 493 (0x1ed), region = 28  ;;  %s937_s8 = sshll.u32 (!%p1070_p12), %s934_s9, 3 }
  0x52   : > { %s193_s10 = scalar_lea.sflag (!%p1070_p12), [#allocation3], %s934_s9  ;;  %s196_s30 = scalar_lea.vmem (!%p1070_p12), [#allocation2], %s937_s8 }
  0x58   : > { %713 = dma.done.wait (%p1071_p4), %s193_s10, 128  }
  0x59   : > { %715 = vsyncadd (%p1071_p4), %s193_s10, 4294967168  ;;  %p1072_p8 = scmp.ne.s32.totalorder %s1059_s21, 0 }
  0x5b   : > { %717 = dma.done.wait (%p1072_p8), [#allocation6], 64  }
  0x5c   : > { %719 = vsyncadd (%p1072_p8), [#allocation6], 4294967232  ;;  %v756_v0 = vmov 0.0   ;;  %vm757_vm0 = vmmov 0   ;;  %vm248_vm1 = vcmask 1045504   ;;  %vm244_vm2 = vcmask 97280  }
  0x5d   : > { %485 = vmatprep.subr.bf16.mxu0 %v756_v0  ;;  %487 = vmatprep.mubr.msk.bf16.mxu0 %vm757_vm0, %v756_v0  ;;  %v573_v1 = vld [vmem:[%s196_s30] sm:$0x3f]   ;;  %v236_v3 = vld [vmem:[#allocation5] sm:$0xf]  ;;  %vm233_vm3 = vcmask 7168   ;;  %s220_s23 = scalar_lea.vmem [#allocation7], %s937_s8 }
  0x5e   : > { %v250_v2 = vsel %vm248_vm1, %v573_v1, 0  ;;  %234 = vst.msk [vmem:[%s220_s23] sm:$0xff] %vm233_vm3, %v756_v0  ;;  %vm293_vm4 = vcmask 130048   ;;  %s952_s21 = scalar_lea.vmem [#allocation8], %s937_s8  ;;  %s478_s26 = sshll.u32 %s742_s15, 7 }
  0x5f   : > { %486 = vmatpush3.bf16.msra.mxu0 %v250_v2  ;;  %235 = vst.msk [vmem:[%s952_s21] sm:$0xff] %vm233_vm3, %v756_v0  ;;  %s326_s29 = sshll.u32 %s220_s23, 4  ;;  %s962_s5 = scalar_lea.hbm %s1051_s2, %s478_s26  ;;  %s964_s29 = int_to_ptr.vmem [resolvable:$true] %s326_s29 }
  0x60   : > { %s339_s20 = sshll.u32 %s952_s21, 4  ;;  %s308_s6 = scalar_lea.sflag [#allocation4], %s934_s9  ;;  %s1000_s20 = int_to_ptr.vmem [resolvable:$true] %s339_s20 }
  0x61   : > { %s632_s11 = scalar_lea.vmem %s964_s29, 128  ;;  %p1073_p10 = scmp.ne.s32.totalorder %s1062_s24, 0 }
  0x62   : > { %488 = vmatmul.mubr.msk.bf16.vlgmr.msra.gmra.mrb[0].mxu0 %vm244_vm2, %v236_v3  ;;  %p633_p5 = scmp.ne.s32.totalorder %s964_s29, %s632_s11  ;;  %s758_s19 = smov [#allocation7]  }
  0x63   : > { %s636_s27 = sshll.u32 %s758_s19, 4  ;;  %s637_s27 = int_to_ptr.vmem [resolvable:$false] %s636_s27 }
  0x64   : > { %p634_p11 = pnand %p633_p5, %p1073_p10  ;;  %s638_s7 = scalar_lea.vmem %s637_s27, 256 }
  0x65   : > { %v292_v11 = vld [vmem:[%s220_s23] sm:$0xff]  ;;  %p639_p0 = scmp.lt.s32.totalorder %s964_s29, %s637_s27  ;;  %p640_p9 = scmp.lt.s32.totalorder %s638_s7, %s632_s11 }
  0x66   : > { %v300_v14 = vld [vmem:[%s952_s21] sm:$0xff]  ;;  %p635_p1 = pneg %p634_p11 }
  0x67   : > { %p641_p3 = por %p640_p9, %p639_p0 }
  0x69   : > { %p642_p7 = pnand %p641_p3, %p635_p1 }
 0x135   : > { %v286_v4 = vpop.f32.mrb[0].mxu0 }
 0x136   : > { %v301_v5 = vmul.f32 %v286_v4, %v286_v4  ;;  %v489_v6 = vpop.f32.mrb[1].mxu0  ;;  %v294_v7 = vsel %vm293_vm4, %v286_v4, 0.0 }
 0x137   : > { %295 = vadd.xlane.f32.xlu0 %v294_v7  ;;  %v289_v8 = vpop.f32.mrb[2].mxu0 }
 0x138   : > { %v490_v9 = vpop.f32.mrb[3].mxu0  ;;  %v302_v10 = vsel %vm293_vm4, %v301_v5, 0.0 }
 0x13b   : > { %303 = vadd.xlane.f32.xlu0 %v302_v10 }
 0x1c4   : > { %v296_v12 = vpop.xlane.xlu0 %295 }
 0x1c5   : > { %v297_v13 = vadd.f32 %v296_v12, %v292_v11 }
 0x1c7   : > { %299 = vst.msk [vmem:[%s220_s23] sm:$0xff] %vm233_vm3, %v297_v13 }
 0x1c8   : > { %v304_v15 = vpop.xlane.xlu0 %303 }
 0x1c9   : > { %645 = shalt.err (!%p642_p7)
}
 0x1ca   : > { %s646_s8 = scalar_lea.hbm %s962_s5, 128  ;;  %s650_s23 = scalar_lea.hbm %s1051_s2, 256 }
 0x1cb   : > { %p647_p13 = scmp.ne.s32.totalorder %s962_s5, %s646_s8  ;;  %p651_p12 = scmp.lt.u32.totalorder %s962_s5, %s1051_s2 }
 0x1cc   : > { %p652_p4 = scmp.lt.u32.totalorder %s650_s23, %s646_s8  ;;  %p654_p5 = scmp.lt.u32.totalorder %s646_s8, %s962_s5 }
 0x1cd   : > { %p648_p2 = pnand %p647_p13, %p1073_p10 }
 0x1ce   : > { %p653_p8 = por %p652_p4, %p651_p12 }
 0x1cf   : > { %p649_p6 = pneg %p648_p2 }
 0x1d0   : > { %p655_p11 = por %p654_p5, %p653_p8 }
 0x1d2   : > { %p656_p1 = pnand %p655_p11, %p649_p6 }
 0x1d4   : > { %659 = shalt.err (!%p656_p1)
}
 0x1d5   : > { %497 = dma.vmem_to_hbm [thread:$0]  (%p1073_p10), %s964_s29, 128, %s962_s5, %s308_s6   ;;  %v305_v16 = vadd.f32 %v304_v15, %v300_v14 }
 0x1d6   : > { %s996_s27 = scalar_lea.hbm %s1052_s3, %s478_s26  ;;  %s313_s7 = scalar_lea.sflag [#allocation9], %s934_s9 }
 0x1d7   : > { %306 = vst.msk [vmem:[%s952_s21] sm:$0xff] %vm233_vm3, %v305_v16  ;;  %s660_s8 = scalar_lea.vmem %s1000_s20, 128  ;;  %s759_s15 = smov [#allocation8]  }
 0x1d8   : > { %p661_p0 = scmp.ne.s32.totalorder %s1000_s20, %s660_s8  ;;  %s664_s29 = sshll.u32 %s759_s15, 4  ;;  %s665_s29 = int_to_ptr.vmem [resolvable:$false] %s664_s29 }
 0x1d9   : > { %s666_s5 = scalar_lea.vmem %s665_s29, 256  ;;  %p667_p7 = scmp.lt.s32.totalorder %s1000_s20, %s665_s29 }
 0x1da   : > { %p662_p9 = pnand %p661_p0, %p1073_p10  ;;  %p668_p13 = scmp.lt.s32.totalorder %s666_s5, %s660_s8 }
 0x1dc   : > { %p663_p3 = pneg %p662_p9  ;;  %p669_p2 = por %p668_p13, %p667_p7 }
 0x1de   : > { %p670_p6 = pnand %p669_p2, %p663_p3 }
 0x1e0   : > { %673 = shalt.err (!%p670_p6)
}
 0x1e1   : > { %s674_s9 = scalar_lea.hbm %s996_s27, 128  ;;  %s678_s6 = scalar_lea.hbm %s1052_s3, 256 }
 0x1e2   : > { %p675_p12 = scmp.ne.s32.totalorder %s996_s27, %s674_s9  ;;  %p679_p5 = scmp.lt.u32.totalorder %s996_s27, %s1052_s3 }
 0x1e3   : > { %p680_p11 = scmp.lt.u32.totalorder %s678_s6, %s674_s9  ;;  %p682_p0 = scmp.lt.u32.totalorder %s674_s9, %s996_s27 }
 0x1e4   : > { %p676_p4 = pnand %p675_p12, %p1073_p10 }
 0x1e5   : > { %p681_p1 = por %p680_p11, %p679_p5 }
 0x1e6   : > { %p677_p8 = pneg %p676_p4 }
 0x1e7   : > { %p683_p9 = por %p682_p0, %p681_p1 }
 0x1e9   : > { %p684_p3 = pnand %p683_p9, %p677_p8 }
 0x1eb   : > { %687 = shalt.err (!%p684_p3)
}
 0x1ec   : > { %498 = dma.vmem_to_hbm [thread:$0]  (%p1073_p10), %s1000_s20, 128, %s996_s27, %s313_s7  }
 0x1ed PF: > { %s351_s23 = sand.u32 1, %s730_s12   ;;  %p1074_p7 = scmp.ne.s32.totalorder %s1063_s25, 0 }
 0x1ee   : > { %p1075_p13 = scmp.ge.s32.totalorder %s750_s17, 2  ;;  %s352_s18 = scalar_lea.sflag [#allocation4], %s351_s23 }
 0x1f0   : > { %p510_p2 = pnand %p1075_p13, %p1074_p7 }
 0x1f2   : > { %721 = dma.done.wait (!%p510_p2), %s352_s18, 128  }
 0x1f3   : > { %723 = vsyncadd (!%p510_p2), %s352_s18, 4294967168  ;;  %s361_s22 = scalar_lea.sflag [#allocation9], %s351_s23 }
 0x1f4   : > { %725 = dma.done.wait (!%p510_p2), %s361_s22, 128  }
 0x1f5   : > { %727 = vsyncadd (!%p510_p2), %s361_s22, 4294967168  ;;  %s24_s17 = sadd.s32 1, %s750_s17   ;;  %s1076_s12 = smov %s734_s13 }
 0x1f6   : > { %p21_p6 = scmp.ge.s32.totalorder %s24_s17, 4   ;;  %s1077_s13 = smov %s738_s14 }
 0x1f7   : > { %s1078_s14 = smov %s899_s28  ;;  %s1079_s15 = smov %s746_s16 }
 0x1f8   : > { %s1080_s16 = smov %s1082_s4  ;;  %23 = sbr.rel (!%p21_p6) target bundleno = 9 (0x9), region = 98 }
 0x1ff   :  { %366 = vsyncpa [#allocation3], 1 }
 0x200   :  { %368 = vsyncpa [#allocation3 + $0x1], 1 }
 0x201   :  { %369 = vsyncpa [#allocation6], 1 }
 0x202   :  { %370 = vsyncpa [#allocation4], 1 }
 0x203   :  { %372 = vsyncpa [#allocation4 + $0x1], 1 }
 0x204   :  { %373 = vsyncpa [#allocation9], 1 }
 0x205   :  { %375 = vsyncpa [#allocation9 + $0x1], 1 }

</bundles_post_ra>
